<compile_context>
chip_gen: v6e
topology: v6e:2x2x1
jax: 0.10.0
libtpu: 0.0.40
codegen_flags: <defaults>
</compile_context>

<pallas_src>
import functools

import jax
import jax.numpy as jnp
from jax.experimental import pallas as pl


def _round_up(x, m):
    return (x + m - 1) // m * m


def _block1_rows(obs_size):
    # Rows of the first packed block (w1 rows + one bias row), padded to a full
    # bf16 sublane tile (16 rows) so the w2 block starts tile-aligned for both
    # f32 and bf16 storage.
    return _round_up(obs_size + 1, 16)


def qfunc_kernel(x_ref, w_ref, o_ref):
    """3 back-to-back MXU matmuls on fully VMEM-resident operands.

    Packed weight layout (rows):
      [0      : obs)      w1                (cols [0:hid])
      [obs    : obs+1)    b1 row, with 1.0 at col `hid` ("ones lane" seed)
      [k1     : k1+P)     w2 (+ b2 at row hid, 1.0 at [hid, hid])
      [k1+P   : k1+2P)    w3 (+ b3 at row hid)
    The ones lane stays exactly 1.0 through each ReLU, so b2/b3 are applied by
    the matmuls themselves; only one broadcast bias-add (layer 1) remains.
    """
    B, obs = x_ref.shape
    P = w_ref.shape[1]
    k1 = _block1_rows(obs)
    cdt = w_ref.dtype          # MXU input dtype (bf16 by default)
    f32 = jnp.float32

    x = x_ref[...].astype(cdt)                  # (B, obs)
    w1 = w_ref[0:obs, :]                        # (obs, P)
    b1 = w_ref[obs:obs + 1, :].astype(f32)      # (1, P) incl. ones-lane 1.0
    w2 = w_ref[k1:k1 + P, :]                    # (P, P), b2 folded in
    w3 = w_ref[k1 + P:k1 + 2 * P, :]            # (P, P), b3 folded in

    # Layer 1: Linear + ReLU (f32 accumulation on the MXU).
    h = jnp.dot(x, w1, preferred_element_type=f32) + b1
    h = jnp.maximum(h, 0.0)
    # Layer 2: Linear + ReLU (bias via ones lane).
    h = jnp.maximum(jnp.dot(h.astype(cdt), w2, preferred_element_type=f32), 0.0)
    # Layer 3: Linear (raw q-values, bias via ones lane).
    q = jnp.dot(h.astype(cdt), w3, preferred_element_type=f32)
    o_ref[...] = q[:, :o_ref.shape[1]].astype(o_ref.dtype)


def pad_params(params, dtype=jnp.bfloat16):
    """Pack + pad weights/biases into one TPU-tiled array ONCE; reuse forever."""
    (w1, b1), (w2, b2), (w3, b3) = params["l1"], params["l2"], params["l3"]
    obs, hid = w1.shape
    nact = w3.shape[1]
    k1 = _block1_rows(obs)
    P = _round_up(max(hid + 1, nact), 128)      # +1 for the ones lane

    blk1 = (jnp.zeros((k1, P), jnp.float32)
            .at[:obs, :hid].set(w1)
            .at[obs, :hid].set(b1)
            .at[obs, hid].set(1.0))             # seed the ones lane
    blk2 = (jnp.zeros((P, P), jnp.float32)
            .at[:hid, :hid].set(w2)
            .at[hid, :hid].set(b2)
            .at[hid, hid].set(1.0))             # propagate the ones lane
    blk3 = (jnp.zeros((P, P), jnp.float32)
            .at[:hid, :nact].set(w3)
            .at[hid, :nact].set(b3))
    return jnp.concatenate([blk1, blk2, blk3], axis=0).astype(dtype)


@functools.partial(jax.jit, static_argnames=("n_actions",))
def qfunction_forward(x, wpk, *, n_actions):
    """x: (B, obs_size). wpk: output of pad_params. Returns (B, n_actions) f32."""
    B, obs = x.shape
    P = wpk.shape[1]

    full = lambda shape: pl.BlockSpec(shape, lambda: (0,) * len(shape))
    flops = 2 * B * (obs * P + 2 * P * P)
    bytes_accessed = (x.size * x.dtype.itemsize
                      + wpk.size * wpk.dtype.itemsize
                      + B * n_actions * 4)

    return pl.pallas_call(
        qfunc_kernel,
        out_shape=jax.ShapeDtypeStruct((B, n_actions), jnp.float32),
        in_specs=[full((B, obs)), full(wpk.shape)],
        out_specs=full((B, n_actions)),
        cost_estimate=pl.CostEstimate(flops=flops, transcendentals=0,
                                      bytes_accessed=bytes_accessed),
    )(x, wpk)


def init_params(key, obs_size, n_actions, hidden_size=100):
    """Deterministic init matching torch.nn.Linear: U(-1/sqrt(fan_in), +1/sqrt(fan_in))."""
    params = {}
    dims = [("l1", obs_size, hidden_size),
            ("l2", hidden_size, hidden_size),
            ("l3", hidden_size, n_actions)]
    for name, fan_in, fan_out in dims:
        key, kw, kb = jax.random.split(key, 3)
        bound = 1.0 / jnp.sqrt(jnp.float32(fan_in))
        w = jax.random.uniform(kw, (fan_in, fan_out), jnp.float32, -bound, bound)
        b = jax.random.uniform(kb, (fan_out,), jnp.float32, -bound, bound)
        params[name] = (w, b)
    return params


def reference_forward(x, params, compute_dtype=jnp.float32):
    """Pure-JAX reference. compute_dtype mimics the kernel's MXU input dtype."""
    (w1, b1), (w2, b2), (w3, b3) = params["l1"], params["l2"], params["l3"]
    c = lambda a: a.astype(compute_dtype)
    f32 = jnp.float32
    h = jnp.dot(c(x), c(w1), preferred_element_type=f32) + c(b1).astype(f32)
    h = jnp.maximum(h, 0.0)
    h = jnp.dot(c(h), c(w2), preferred_element_type=f32) + c(b2).astype(f32)
    h = jnp.maximum(h, 0.0)
    return jnp.dot(c(h), c(w3), preferred_element_type=f32) + c(b3).astype(f32)


if __name__ == "__main__":
    obs_size, n_actions, hidden_size = 4, 3, 100
    batch = 2

    key = jax.random.PRNGKey(0)
    key, kx = jax.random.split(key)
    x = jax.random.normal(kx, (batch, obs_size), jnp.float32)
    params = init_params(key, obs_size, n_actions, hidden_size)

    # Pack/pad once at init (bf16 weights: native MXU dtype, half the DMA bytes).
    wpk = pad_params(params, dtype=jnp.bfloat16)

    q = qfunction_forward(x, wpk, n_actions=n_actions)
    q = jax.block_until_ready(q)
    assert q.shape == (batch, n_actions)

    # Tight check against a precision-matched (bf16-input, f32-accum) reference:
    q_ref_bf16 = reference_forward(x, params, compute_dtype=jnp.bfloat16)
    assert jnp.allclose(q, q_ref_bf16, atol=1e-4, rtol=1e-4)
    # Loose fidelity check against the full-f32 PyTorch-equivalent forward:
    q_ref_f32 = reference_forward(x, params, compute_dtype=jnp.float32)
    assert jnp.allclose(q, q_ref_f32, atol=5e-2, rtol=5e-2)

    # TODO(synk): DiscreteActionValue wrapper (greedy_actions / max / evaluate)
    # is a lazy container with no tensor compute; kernel returns the raw q-values.
    print("KERNEL_OK")
</pallas_src>

<mosaic_0001>
module attributes {stable_mosaic.version = 11 : i64} {
  func.func @qfunc_kernel(%arg0: memref<2x4xf32, #tpu.memory_space<vmem>>, %arg1: memref<272x128xbf16, #tpu.memory_space<vmem>>, %arg2: memref<2x3xf32, #tpu.memory_space<vmem>>) attributes {dimension_semantics = [], scalar_prefetch = 0 : i64, scratch_operands = 0 : i64, tpu.core_type = #tpu.core_type<tc>} {
    %c0 = arith.constant 0 : index
    %c0_0 = arith.constant 0 : index
    %0 = vector.load %arg0[%c0, %c0_0] : memref<2x4xf32, #tpu.memory_space<vmem>>, vector<2x4xf32>
    %1 = arith.truncf %0 : vector<2x4xf32> to vector<2x4xbf16>
    %c0_1 = arith.constant 0 : index
    %c0_2 = arith.constant 0 : index
    %2 = vector.load %arg1[%c0_1, %c0_2] : memref<272x128xbf16, #tpu.memory_space<vmem>>, vector<4x128xbf16>
    %c4 = arith.constant 4 : index
    %c0_3 = arith.constant 0 : index
    %3 = vector.load %arg1[%c4, %c0_3] : memref<272x128xbf16, #tpu.memory_space<vmem>>, vector<1x128xbf16>
    %4 = arith.extf %3 : vector<1x128xbf16> to vector<1x128xf32>
    %c16 = arith.constant 16 : index
    %c0_4 = arith.constant 0 : index
    %5 = vector.load %arg1[%c16, %c0_4] : memref<272x128xbf16, #tpu.memory_space<vmem>>, vector<128x128xbf16>
    %c144 = arith.constant 144 : index
    %c0_5 = arith.constant 0 : index
    %6 = vector.load %arg1[%c144, %c0_5] : memref<272x128xbf16, #tpu.memory_space<vmem>>, vector<128x128xbf16>
    %cst = arith.constant dense<0.000000e+00> : vector<2x128xf32>
    %7 = tpu.matmul %1, %2, %cst {dimension_numbers = #tpu.dot_dimension_numbers<[1], [0], [0], [1], [0, 0, 1, 1], [], []>} : vector<2x4xbf16>, vector<4x128xbf16>, vector<2x128xf32> -> vector<2x128xf32>
    %8 = vector.broadcast %4 : vector<1x128xf32> to vector<2x128xf32>
    %9 = arith.addf %7, %8 : vector<2x128xf32>
    %cst_6 = arith.constant 0.000000e+00 : f32
    %10 = vector.broadcast %cst_6 : f32 to vector<2x128xf32>
    %11 = arith.maximumf %9, %10 : vector<2x128xf32>
    %12 = arith.truncf %11 : vector<2x128xf32> to vector<2x128xbf16>
    %cst_7 = arith.constant dense<0.000000e+00> : vector<2x128xf32>
    %13 = tpu.matmul %12, %5, %cst_7 {dimension_numbers = #tpu.dot_dimension_numbers<[1], [0], [0], [1], [0, 0, 1, 1], [], []>} : vector<2x128xbf16>, vector<128x128xbf16>, vector<2x128xf32> -> vector<2x128xf32>
    %cst_8 = arith.constant 0.000000e+00 : f32
    %14 = vector.broadcast %cst_8 : f32 to vector<2x128xf32>
    %15 = arith.maximumf %13, %14 : vector<2x128xf32>
    %16 = arith.truncf %15 : vector<2x128xf32> to vector<2x128xbf16>
    %cst_9 = arith.constant dense<0.000000e+00> : vector<2x128xf32>
    %17 = tpu.matmul %16, %6, %cst_9 {dimension_numbers = #tpu.dot_dimension_numbers<[1], [0], [0], [1], [0, 0, 1, 1], [], []>} : vector<2x128xbf16>, vector<128x128xbf16>, vector<2x128xf32> -> vector<2x128xf32>
    %18 = vector.extract_strided_slice %17 {offsets = [0, 0], sizes = [2, 3], strides = [1, 1]} : vector<2x128xf32> to vector<2x3xf32>
    %c0_10 = arith.constant 0 : index
    %c0_11 = arith.constant 0 : index
    %19 = vector.load %arg2[%c0_10, %c0_11] : memref<2x3xf32, #tpu.memory_space<vmem>>, vector<2x3xf32>
    tpu.vector_store %arg2[%c0_10, %c0_11], %18 {strides = array<i32>} : memref<2x3xf32, #tpu.memory_space<vmem>>, vector<2x3xf32>,
    return
  }
}

</mosaic_0001>

<bundles_post_ra>
// kernel: qfunction_forward.1
= control target key start
LH: loop header
LB: loop body
LE: loop exit
PB: predicated region body
PF: predicated region fallthrough
CT: control target
= control target key end

     0   :  { %7 = vsyncpa [#allocation3], 0  ;;  %s532_s0 = inlined_call_operand.hbm [shape: f32[2,4], index: 0, kind: input, shape index: {}]   ;;  %s533_s1 = inlined_call_operand.hbm [shape: bf16[272,128], index: 1, kind: input, shape index: {}]   ;;  %s534_s2 = inlined_call_operand.hbm [shape: f32[2,3], index: 2, kind: output, shape index: {}]  }
   0x1   :  { %8 = vsyncpa [#allocation6], 0 }
   0x2   :  { %9 = vsyncpa [#allocation4], 0  ;;  %s498_s9 = smov [#allocation2]   ;;  %s499_s11 = smov [#allocation5]  }
   0x3   :  { %s16_s10 = sshll.u32 %s498_s9, 4  ;;  %s25_s12 = sshll.u32 %s499_s11, 4  ;;  %s17_s10 = int_to_ptr.vmem [resolvable:$true] %s16_s10  ;;  %s26_s12 = int_to_ptr.vmem [resolvable:$true] %s25_s12 }
   0x4   :  { %s440_s13 = scalar_lea.vmem %s17_s10, 32  ;;  %p445_p1 = scmp.lt.s32.totalorder %s17_s10, %s17_s10 }
   0x5   :  { %p441_p0 = scmp.ne.s32.totalorder %s17_s10, %s440_s13  ;;  %p446_p2 = scmp.lt.s32.totalorder %s440_s13, %s440_s13 }
   0x7   :  { %p447_p3 = por %p446_p2, %p445_p1 }
   0x9   :  { %p448_p4 = pnand %p447_p3, %p441_p0 }
   0xb   :  { %451 = shalt.err (!%p448_p4)
}
   0xc   :  { %19 = dma.hbm_to_vmem [thread:$0]  %s532_s0, 32, %s17_s10, [#allocation3]  }
   0xd   :  { %s460_s16 = scalar_lea.vmem %s26_s12, 2176  ;;  %p465_p6 = scmp.lt.s32.totalorder %s26_s12, %s26_s12 }
   0xe   :  { %p461_p5 = scmp.ne.s32.totalorder %s26_s12, %s460_s16  ;;  %p466_p7 = scmp.lt.s32.totalorder %s460_s16, %s460_s16 }
  0x10   :  { %p467_p8 = por %p466_p7, %p465_p6 }
  0x12   :  { %p468_p9 = pnand %p467_p8, %p461_p5 }
  0x14   :  { %471 = shalt.err (!%p468_p9)
}
  0x15   :  { %s500_s17 = smov 64   ;;  %s501_s18 = smov 4  }
  0x16   :  { %31 = dma.hbm_to_vmem [thread:$0]  %s533_s1, 2176, %s26_s12, [#allocation6], %s500_s17, %s500_s17, %s501_s18  }
  0x17   :  { %492 = dma.done.wait [#allocation3], 32  }
  0x18   :  { %493 = vsyncadd [#allocation3], 4294967264 }
  0x19   :  { %494 = dma.done.wait [#allocation6], 2176  }
  0x1a   :  { %495 = vsyncadd [#allocation6], 4294965120  ;;  %v502_v0 = vmov 0.0   ;;  %vm503_vm0 = vmmov 0   ;;  %vm84_vm1 = vcmask 1041408   ;;  %v416_v5 = vld [vmem:[#allocation5 + $0x40] sm:$0xff]   ;;  %v76_v20 = vlaneseq }
  0x1b   :  { %363 = vmatprep.subr.bf16.mxu0 %v502_v0  ;;  %365 = vmatprep.mubr.msk.bf16.mxu0 %vm503_vm0, %v502_v0  ;;  %v41_v1 = vld [vmem:[#allocation5] sm:$0x3]  ;;  %v39_v2 = vld [vmem:[#allocation2] sm:$0x3]  ;;  %vm80_vm2 = vcmask 31744   ;;  %v418_v7 = vld [vmem:[#allocation5 + $0x30] sm:$0xff]  }
  0x1c   :  { %369 = vmatprep.subr.bf16.mxu1 %v502_v0  ;;  %385 = vmatprep.mubr.msk.bf16.mxu1 %vm503_vm0, %v502_v0  ;;  %v86_v3 = vsel %vm84_vm1, %v41_v1, 0  ;;  %v40_v4 = vpack.c.bf16 %v39_v2, %v39_v2  ;;  %v417_v6 = vld [vmem:[#allocation5 + $0x38] sm:$0xff]   ;;  %v419_v8 = vld [vmem:[#allocation5 + $0x28] sm:$0xff]   ;;  %v420_v9 = vld [vmem:[#allocation5 + $0x20] sm:$0xff]   ;;  %v77_v21 = vshrl.u32 %v76_v20, 7  ;;  %s504_s0 = smov [#allocation7]  }
  0x1d   :  { %364 = vmatpush3.bf16.msra.mxu0 %v86_v3  ;;  %370 = vmatpush3.bf16.msra.mxu1 %v416_v5  ;;  %v421_v10 = vld [vmem:[#allocation5 + $0x18] sm:$0xff]   ;;  %v422_v11 = vld [vmem:[#allocation5 + $0x10] sm:$0xff]   ;;  %v423_v12 = vld [vmem:[#allocation5 + $0x8] sm:$0xff]   ;;  %s316_s1 = sshll.u32 %s504_s0, 4  ;;  %vm308_vm3 = vcmask 17408   ;;  %s317_s1 = int_to_ptr.vmem [resolvable:$true] %s316_s1 }
  0x1e   :  { %389 = vmatprep.subr.bf16.mxu0 %v502_v0  ;;  %371 = vmatprep.subr.bf16.mxu1 %v502_v0  ;;  %v424_v13 = vld [vmem:[#allocation5 + $0x80] sm:$0xff]   ;;  %v425_v14 = vld [vmem:[#allocation5 + $0x78] sm:$0xff]   ;;  %v426_v15 = vld [vmem:[#allocation5 + $0x70] sm:$0xff]   ;;  %v78_v24 = vsub.s32 4, %v77_v21  ;;  %s472_s21 = scalar_lea.vmem %s317_s1, 32  ;;  %p477_p11 = scmp.lt.s32.totalorder %s317_s1, %s317_s1 }
  0x1f   :  { %v427_v16 = vld [vmem:[#allocation5 + $0x68] sm:$0xff]   ;;  %v428_v17 = vld [vmem:[#allocation5 + $0x60] sm:$0xff]   ;;  %v429_v18 = vld [vmem:[#allocation5 + $0x58] sm:$0xff]   ;;  %p473_p10 = scmp.ne.s32.totalorder %s317_s1, %s472_s21  ;;  %p478_p12 = scmp.lt.s32.totalorder %s472_s21, %s472_s21 }
  0x20   :  { %366 = vmatmul.mubr.msk.bf16.vlgmr.msra.gmra.mxu0 %vm80_vm2, %v40_v4  ;;  %v430_v19 = vld [vmem:[#allocation5 + $0x50] sm:$0xff]   ;;  %v42_v22 = vld [vmem:[#allocation5] sm:$0x4]  ;;  %v431_v33 = vld [vmem:[#allocation5 + $0x48] sm:$0xff]  }
  0x21   :  { %405 = vmatprep.mubr.msk.bf16.mxu0 %vm503_vm0, %v502_v0  ;;  %372 = vmatpush3.bf16.msra.mxu1 %v417_v6  ;;  %v43_v23 = vunpack.c.l.bf16 %v42_v22  ;;  %p479_p13 = por %p478_p12, %p477_p11 }
  0x22   :  { %373 = vmatprep.subr.bf16.mxu1 %v502_v0  ;;  %390 = vmatpush3.bf16.msra.mxu0 %v424_v13 }
  0x23   :  { %391 = vmatprep.subr.bf16.mxu0 %v502_v0  ;;  %v79_v25 = vrot.slane %v43_v23, %v78_v24  ;;  %p480_p0 = pnand %p479_p13, %p473_p10 }
  0x25   :  { %374 = vmatpush3.bf16.msra.mxu1 %v418_v7 }
  0x26   :  { %375 = vmatprep.subr.bf16.mxu1 %v502_v0  ;;  %392 = vmatpush3.bf16.msra.mxu0 %v425_v14 }
  0x27   :  { %393 = vmatprep.subr.bf16.mxu0 %v502_v0 }
  0x29   :  { %376 = vmatpush3.bf16.msra.mxu1 %v419_v8 }
  0x2a   :  { %377 = vmatprep.subr.bf16.mxu1 %v502_v0  ;;  %394 = vmatpush3.bf16.msra.mxu0 %v426_v15 }
  0x2b   :  { %395 = vmatprep.subr.bf16.mxu0 %v502_v0 }
  0x2d   :  { %378 = vmatpush3.bf16.msra.mxu1 %v420_v9 }
  0x2e   :  { %379 = vmatprep.subr.bf16.mxu1 %v502_v0  ;;  %396 = vmatpush3.bf16.msra.mxu0 %v427_v16 }
  0x2f   :  { %397 = vmatprep.subr.bf16.mxu0 %v502_v0 }
  0x31   :  { %380 = vmatpush3.bf16.msra.mxu1 %v421_v10 }
  0x32   :  { %381 = vmatprep.subr.bf16.mxu1 %v502_v0  ;;  %398 = vmatpush3.bf16.msra.mxu0 %v428_v17 }
  0x33   :  { %399 = vmatprep.subr.bf16.mxu0 %v502_v0 }
  0x35   :  { %382 = vmatpush3.bf16.msra.mxu1 %v422_v11 }
  0x36   :  { %383 = vmatprep.subr.bf16.mxu1 %v502_v0  ;;  %400 = vmatpush3.bf16.msra.mxu0 %v429_v18 }
  0x37   :  { %401 = vmatprep.subr.bf16.mxu0 %v502_v0 }
  0x39   :  { %384 = vmatpush3.bf16.msra.mxu1 %v423_v12 }
  0x3a   :  { %402 = vmatpush3.bf16.msra.mxu0 %v430_v19 }
  0x3b   :  { %403 = vmatprep.subr.bf16.mxu0 %v502_v0 }
  0x3e   :  { %404 = vmatpush3.bf16.msra.mxu0 %v431_v33 }
  0xe0   :  { %v122_v26 = vpop.f32.mrf.mxu0 }
  0xe1   :  { %v123_v27 = vadd.f32 %v122_v26, %v79_v25 }
  0xe2   :  { %v367_v28 = vpop.f32.mrf.mxu0 }
  0xe3   :  { %v128_v29 = vmax.f32 %v123_v27, 0.0 }
  0xe4   :  { %v125_v30 = vpop.f32.mrf.mxu0 }
  0xe5   :  { %v129_v31 = vpack.c.bf16 %v128_v29, %v128_v29 }
  0xe6   :  { %v368_v32 = vpop.f32.mrf.mxu0 }
  0xe7   :  { %386 = vmatmul.mubr.bf16.vlgmr.msra.gmra.mxu1 %v129_v31 }
 0x1a7   :  { %v212_v34 = vpop.f32.mrf.mxu1 }
 0x1a8   :  { %v218_v35 = vmax.f32 %v212_v34, 0.0 }
 0x1a9   :  { %v387_v36 = vpop.f32.mrf.mxu1 }
 0x1aa   :  { %v219_v37 = vpack.c.bf16 %v218_v35, %v218_v35 }
 0x1ab   :  { %v215_v38 = vpop.f32.mrf.mxu1 }
 0x1ac   :  { %406 = vmatmul.mubr.bf16.vlgmr.msra.gmra.mxu0 %v219_v37 }
 0x1ad   :  { %v388_v39 = vpop.f32.mrf.mxu1 }
 0x26c   :  { %v302_v40 = vpop.f32.mrf.mxu0 }
 0x26d   :  { %309 = vst.msk [vmem:[#allocation7] sm:$0x3] %vm308_vm3, %v302_v40 }
 0x26e   :  { %v407_v41 = vpop.f32.mrf.mxu0 }
 0x26f   :  { %483 = shalt.err (!%p480_p0)
}
 0x270   :  { %319 = dma.vmem_to_hbm [thread:$0]  %s317_s1, 32, %s534_s2, [#allocation4]   ;;  %v305_v42 = vpop.f32.mrf.mxu0 }
 0x272   :  { %v408_v43 = vpop.f32.mrf.mxu0 }
 0x273   :  { %496 = dma.done.wait [#allocation4], 32  }
 0x274   :  { %497 = vsyncadd [#allocation4], 4294967264 }
 0x275   :  { %323 = vsyncpa [#allocation3], 1 }
 0x276   :  { %324 = vsyncpa [#allocation6], 1 }
 0x277   :  { %325 = vsyncpa [#allocation4], 1 }

</bundles_post_ra>
